<compile_context>
chip_gen: v7x
topology: tpu7x:2x2x1
jax: 0.10.0
libtpu: 0.0.40
codegen_flags: <defaults>
</compile_context>

<pallas_src>
import functools

import jax
import jax.numpy as jnp
from jax.experimental import pallas as pl
from jax.experimental.pallas import tpu as pltpu


def _conv_bn_relu_kernel(w_ref, p_ref, shift_ref, o_ref, *, apply_relu):
    # w_ref:     (O, K)   conv weight with BN scale folded in (compute dtype)
    # p_ref:     (K, TM)  im2col patches tile (compute dtype), M on lanes
    # shift_ref: (O, 1)   beta - running_mean * scale  (f32)
    # o_ref:     (O, TM)  lane-dense output tile
    acc = jnp.dot(w_ref[...], p_ref[...], preferred_element_type=jnp.float32)
    y = acc + shift_ref[...]
    if apply_relu:
        y = jnp.maximum(y, 0.0)
    o_ref[...] = y.astype(o_ref.dtype)


def _im2col_km(x, kh, kw, stride, padding, dilation):
    """x: (N, C, H, W) -> patches (C*KH*KW, N*OH*OW); K ordered (C, KH, KW)."""
    n, c, h, w = x.shape
    xp = jnp.pad(x, ((0, 0), (0, 0), (padding, padding), (padding, padding)))
    eff_kh = (kh - 1) * dilation + 1
    eff_kw = (kw - 1) * dilation + 1
    oh = (h + 2 * padding - eff_kh) // stride + 1
    ow = (w + 2 * padding - eff_kw) // stride + 1

    cols = []
    for i in range(kh):
        for j in range(kw):
            r0 = i * dilation
            c0 = j * dilation
            sl = xp[:, :, r0:r0 + (oh - 1) * stride + 1:stride,
                          c0:c0 + (ow - 1) * stride + 1:stride]   # (N, C, OH, OW)
            cols.append(sl)
    pat = jnp.stack(cols, axis=0)                  # (KH*KW, N, C, OH, OW)
    pat = jnp.transpose(pat, (2, 0, 1, 3, 4))      # (C, KH*KW, N, OH, OW)
    pat = pat.reshape(c * kh * kw, n * oh * ow)    # (K, M)
    return pat, oh, ow


def _round_up(v, a):
    return -(-v // a) * a


def _pick_tm(m, k, o, in_bytes, out_bytes, tm_max, vmem_budget):
    """Largest 128-multiple lane tile fitting a conservative VMEM budget
    (2x patches tile + resident weight + 2x output tile), capped so the grid
    keeps >= 2 steps when possible (v7x runs the grid on 2 TensorCores)."""
    tm = min(tm_max, max(128, _round_up(m, 128)))
    while tm > 128:
        footprint = (2 * k * tm * in_bytes + k * o * in_bytes
                     + 2 * o * tm * out_bytes + 2 * o * out_bytes)
        if footprint <= vmem_budget:
            break
        tm = max(128, _round_up(tm // 2, 128))
    if m > 128 and pl.cdiv(m, tm) < 2:
        tm = max(128, min(tm, _round_up(pl.cdiv(m, 2), 128)))
    return tm


def basic_conv_forward(x, weight, gamma=None, beta=None,
                       running_mean=None, running_var=None,
                       *, stride=1, padding=0, dilation=1, groups=1,
                       eps=1e-5, relu=True, bn=True,
                       compute_dtype=jnp.bfloat16,
                       tm_max=2048, vmem_budget_bytes=24 * 1024 * 1024):
    """Matches PyTorch BasicConv.forward (Conv2d bias=False, BatchNorm2d with
    running stats / eval mode, optional ReLU).

    x:      (N, C, H, W) float32, NCHW
    weight: (O, C, KH, KW) float32 (PyTorch Conv2d layout)
    """
    assert groups == 1, "TODO(synk): grouped conv (groups != 1) not implemented"
    n, c, h, w = x.shape
    o, c_w, kh, kw = weight.shape
    assert c_w == c

    patches, oh, ow = _im2col_km(x, kh, kw, stride, padding, dilation)  # (K, M)
    k, m = patches.shape

    w2d = weight.reshape(o, k).astype(jnp.float32)            # (O, K)
    if bn:
        scale = gamma / jnp.sqrt(running_var + eps)            # (O,)
        shift = beta - running_mean * scale                    # (O,)
        w2d = w2d * scale[:, None]                             # fold BN scale into weight
    else:
        shift = jnp.zeros((o,), jnp.float32)
    shift = shift.reshape(o, 1).astype(jnp.float32)

    # bf16 operands for the MXU; accumulation/epilogue stay f32 in-kernel.
    patches = patches.astype(compute_dtype)
    w2d = w2d.astype(compute_dtype)

    in_bytes = jnp.dtype(compute_dtype).itemsize
    out_bytes = jnp.dtype(x.dtype).itemsize
    tm = _pick_tm(m, k, o, in_bytes, out_bytes, tm_max, vmem_budget_bytes)

    grid = (pl.cdiv(m, tm),)   # ragged tail masked by Pallas; no pad, no slice
    kernel = functools.partial(_conv_bn_relu_kernel, apply_relu=relu)

    out = pl.pallas_call(
        kernel,
        out_shape=jax.ShapeDtypeStruct((o, m), x.dtype),
        grid_spec=pltpu.PrefetchScalarGridSpec(
            num_scalar_prefetch=0,
            grid=grid,
            in_specs=[
                pl.BlockSpec((o, k), lambda i: (0, 0)),    # weight, VMEM-resident
                pl.BlockSpec((k, tm), lambda i: (0, i)),   # patches, lane-dense
                pl.BlockSpec((o, 1), lambda i: (0, 0)),    # BN shift
            ],
            out_specs=pl.BlockSpec((o, tm), lambda i: (0, i)),
        ),
        compiler_params=pltpu.CompilerParams(
            dimension_semantics=("parallel",),
            # Let XLA fuse the im2col producer into the patches input DMA so
            # the KH*KW-inflated buffer need not round-trip through HBM.
            allow_input_fusion=[False, True, False],
        ),
    )(w2d, patches, shift)

    # (O, M) -> (O, N, OH, OW) -> NCHW (PyTorch convention).
    # TODO(synk): emit (O, M) / NHWC directly if downstream consumers allow it.
    out = out.reshape(o, n, oh, ow)
    return jnp.transpose(out, (1, 0, 2, 3))


def reference_forward(x, weight, gamma, beta, running_mean, running_var,
                      *, stride, padding, dilation, eps=1e-5, relu=True):
    y = jax.lax.conv_general_dilated(
        x, weight,
        window_strides=(stride, stride),
        padding=[(padding, padding), (padding, padding)],
        rhs_dilation=(dilation, dilation),
        dimension_numbers=("NCHW", "OIHW", "NCHW"))
    scale = (gamma / jnp.sqrt(running_var + eps)).reshape(1, -1, 1, 1)
    shift = (beta - running_mean * gamma / jnp.sqrt(running_var + eps)).reshape(1, -1, 1, 1)
    y = y * scale + shift
    if relu:
        y = jnp.maximum(y, 0.0)
    return y


if __name__ == "__main__":
    # BasicConv(in_planes=4, out_planes=8, kernel_size=3, stride=1, padding=1)
    N, C, H, W = 2, 4, 16, 16
    O, KH, KW = 8, 3, 3
    stride, padding, dilation = 1, 1, 1

    key = jax.random.PRNGKey(0)
    kx, kw_, kg, kb, km, kv = jax.random.split(key, 6)

    x = jax.random.normal(kx, (N, C, H, W), jnp.float32)
    fan = C * KH * KW
    weight = jax.random.normal(kw_, (O, C, KH, KW), jnp.float32) * (1.0 / fan) ** 0.5
    gamma = 1.0 + 0.1 * jax.random.normal(kg, (O,), jnp.float32)
    beta = 0.1 * jax.random.normal(kb, (O,), jnp.float32)
    running_mean = 0.1 * jax.random.normal(km, (O,), jnp.float32)
    running_var = jnp.abs(jax.random.normal(kv, (O,), jnp.float32)) + 0.5

    ref = reference_forward(x, weight, gamma, beta, running_mean, running_var,
                            stride=stride, padding=padding, dilation=dilation)

    # f32 compute path (tight tolerance).
    fwd_f32 = jax.jit(functools.partial(
        basic_conv_forward, stride=stride, padding=padding, dilation=dilation,
        compute_dtype=jnp.float32))
    out_f32 = jax.block_until_ready(
        fwd_f32(x, weight, gamma, beta, running_mean, running_var))
    assert out_f32.shape == (N, O, H, W), out_f32.shape
    assert jnp.allclose(out_f32, ref, atol=1e-3, rtol=1e-3), \
        float(jnp.abs(out_f32 - ref).max())

    # bf16 compute path (MXU-native fast path; bf16 quantization tolerance).
    fwd_bf16 = jax.jit(functools.partial(
        basic_conv_forward, stride=stride, padding=padding, dilation=dilation,
        compute_dtype=jnp.bfloat16))
    out_bf16 = jax.block_until_ready(
        fwd_bf16(x, weight, gamma, beta, running_mean, running_var))
    assert out_bf16.shape == (N, O, H, W), out_bf16.shape
    assert jnp.allclose(out_bf16, ref, atol=5e-2, rtol=5e-2), \
        float(jnp.abs(out_bf16 - ref).max())

    print("KERNEL_OK")
</pallas_src>

<mosaic_0001>
module attributes {stable_mosaic.version = 11 : i64} {
  func.func @_conv_bn_relu_kernel(%arg0: i32, %arg1: memref<8x36xf32, #tpu.memory_space<vmem>>, %arg2: memref<36x256xf32, #tpu.memory_space<vmem>>, %arg3: memref<8x1xf32, #tpu.memory_space<vmem>>, %arg4: memref<8x256xf32, #tpu.memory_space<vmem>>) attributes {dimension_semantics = [#tpu.dimension_semantics<parallel>], iteration_bounds = array<i64: 2>, scalar_prefetch = 0 : i64, scratch_operands = 0 : i64, tpu.core_type = #tpu.core_type<tc>, window_params = [{pipeline_mode = #tpu.pipeline_mode<synchronous>, transform_indices = @transform_0, window_bounds = array<i64: 8, 36>}, {transform_indices = @transform_1, window_bounds = array<i64: 36, 256>}, {pipeline_mode = #tpu.pipeline_mode<synchronous>, transform_indices = @transform_2, window_bounds = array<i64: 8, 1>}, {transform_indices = @transform_3, window_bounds = array<i64: 8, 256>}]} {
    %c0 = arith.constant 0 : index
    %c0_0 = arith.constant 0 : index
    %0 = vector.load %arg1[%c0, %c0_0] : memref<8x36xf32, #tpu.memory_space<vmem>>, vector<8x36xf32>
    %c0_1 = arith.constant 0 : index
    %c0_2 = arith.constant 0 : index
    %1 = vector.load %arg2[%c0_1, %c0_2] : memref<36x256xf32, #tpu.memory_space<vmem>>, vector<36x256xf32>
    %cst = arith.constant dense<0.000000e+00> : vector<8x256xf32>
    %2 = tpu.matmul %0, %1, %cst {dimension_numbers = #tpu.dot_dimension_numbers<[1], [0], [0], [1], [0, 0, 1, 1], [], []>} : vector<8x36xf32>, vector<36x256xf32>, vector<8x256xf32> -> vector<8x256xf32>
    %c0_3 = arith.constant 0 : index
    %c0_4 = arith.constant 0 : index
    %3 = vector.load %arg3[%c0_3, %c0_4] : memref<8x1xf32, #tpu.memory_space<vmem>>, vector<8x1xf32>
    %4 = vector.broadcast %3 : vector<8x1xf32> to vector<8x256xf32>
    %5 = arith.addf %2, %4 : vector<8x256xf32>
    %cst_5 = arith.constant 0.000000e+00 : f32
    %6 = vector.broadcast %cst_5 : f32 to vector<8x256xf32>
    %7 = arith.maximumf %5, %6 : vector<8x256xf32>
    %c0_6 = arith.constant 0 : index
    %c0_7 = arith.constant 0 : index
    %8 = vector.load %arg4[%c0_6, %c0_7] : memref<8x256xf32, #tpu.memory_space<vmem>>, vector<8x256xf32>
    tpu.vector_store %arg4[%c0_6, %c0_7], %7 {strides = array<i32>} : memref<8x256xf32, #tpu.memory_space<vmem>>, vector<8x256xf32>,
    return
  }
  func.func @transform_0(%arg0: i32) -> (i32, i32) {
    %c0_i32 = arith.constant 0 : i32
    %c0_i32_0 = arith.constant 0 : i32
    %c0_i32_1 = arith.constant 0 : i32
    return %c0_i32, %c0_i32_0 : i32, i32
  }
  func.func @transform_1(%arg0: i32) -> (i32, i32) {
    %c0_i32 = arith.constant 0 : i32
    %c0_i32_0 = arith.constant 0 : i32
    return %c0_i32, %arg0 : i32, i32
  }
  func.func @transform_2(%arg0: i32) -> (i32, i32) {
    %c0_i32 = arith.constant 0 : i32
    %c0_i32_0 = arith.constant 0 : i32
    %c0_i32_1 = arith.constant 0 : i32
    return %c0_i32, %c0_i32_0 : i32, i32
  }
  func.func @transform_3(%arg0: i32) -> (i32, i32) {
    %c0_i32 = arith.constant 0 : i32
    %c0_i32_0 = arith.constant 0 : i32
    return %c0_i32, %arg0 : i32, i32
  }
}

</mosaic_0001>

<bundles_post_ra>
// kernel: basic_conv_forward.1
= control target key start
LH: loop header
LB: loop body
LE: loop exit
PB: predicated region body
PF: predicated region fallthrough
CT: control target
= control target key end

     0   :  { %s474_s12 = smov 0   ;;  %s476_s13 = smov 0   ;;  %s532_s0 = inlined_call_operand.vmem [shape: f32[8,36], index: 0, kind: input, shape index: {}]   ;;  %s533_s1 = inlined_call_operand.vmem [shape: f32[36,512], index: 1, kind: input, shape index: {}]   ;;  %s534_s2 = inlined_call_operand.vmem [shape: f32[8,1], index: 2, kind: input, shape index: {}]   ;;  %s535_s3 = inlined_call_operand.vmem [shape: f32[8,512], index: 3, kind: output, shape index: {}]  }
   0x1   :  { %s478_s14 = smov 0  }
   0x2 LB: > { %s376_s15 = sadd.s32 4294967295, %s450_s14   ;;  %s491_s16 = sadd.s32 1, %s450_s14   ;;  %s450_s14 = sphi %s478_s14, %s538_s14   ;;  %s446_s13 = sphi %s476_s13, %s537_s13   ;;  %s442_s12 = sphi %s474_s12, %s536_s12  }
   0x3   : > { %s38_s17 = ssub.s32 %s450_s14, %s491_s16  ;;  %s41_s18 = sadd.s32 1, %s446_s13 }
   0x4   : > { %p39_p0 = scmp.eq.s32.totalorder %s38_s17, 0  ;;  %p48_p1 = scmp.ne.s32.totalorder %s446_s13, %s442_s12 }
   0x5   : > { %p49_p2 = scmp.eq.s32.totalorder %s450_s14, 0  ;;  %p379_p4 = scmp.ge.s32.totalorder %s450_s14, 2 }
   0x6   : > { %s500_s19 = scalar_select %p39_p0, %s446_s13, %s41_s18  }
   0x7   : > { %p50_p3 = por %p49_p2, %p48_p1  ;;  %127 = sbr.rel (%p379_p4) target bundleno = 23 (0x17), region = 24 }
   0xe   : > { %130 = sbr.rel (!%p50_p3) target bundleno = 23 (0x17), region = 28  ;;  %s132_s20 = sand.u32 (%p50_p3), 1, %s446_s13  }
   0xf   : > { %s390_s21 = sshll.u32 (%p50_p3), %s450_s14, 4  ;;  %s399_s22 = smul.u32 (%p50_p3), 80, %s132_s20 }
  0x10   : > { %s137_s25 = scalar_lea.vmem (%p50_p3), %s533_s1, %s390_s21 }
  0x11   : > { %v150_v0 = vld [vmem:[%s137_s25] sm:$0xff] (%p50_p3)  ;;  %v152_v1 = vld [vmem:[%s137_s25 + $0x8] sm:$0xff] (%p50_p3)  ;;  %s134_s26 = scalar_lea.vmem (%p50_p3), [#allocation2], %s399_s22 }
  0x12   : > { %v154_v2 = vld [vmem:[%s137_s25 + $0x20] sm:$0xff] (%p50_p3)  ;;  %v156_v3 = vld [vmem:[%s137_s25 + $0x28] sm:$0xff] (%p50_p3)  ;;  %151 = vst [vmem:[%s134_s26] sm:$0xff] (%p50_p3), %v150_v0  ;;  %153 = vst [vmem:[%s134_s26 + $0x8] sm:$0xff] (%p50_p3), %v152_v1 }
  0x13   : > { %v158_v4 = vld [vmem:[%s137_s25 + $0x40] sm:$0xff] (%p50_p3)  ;;  %v160_v5 = vld [vmem:[%s137_s25 + $0x48] sm:$0xff] (%p50_p3)  ;;  %155 = vst [vmem:[%s134_s26 + $0x10] sm:$0xff] (%p50_p3), %v154_v2  ;;  %157 = vst [vmem:[%s134_s26 + $0x18] sm:$0xff] (%p50_p3), %v156_v3 }
  0x14   : > { %159 = vst [vmem:[%s134_s26 + $0x20] sm:$0xff] (%p50_p3), %v158_v4  ;;  %161 = vst [vmem:[%s134_s26 + $0x28] sm:$0xff] (%p50_p3), %v160_v5  ;;  %v162_v6 = vld [vmem:[%s137_s25 + $0x60] sm:$0xff] (%p50_p3)  ;;  %v164_v7 = vld [vmem:[%s137_s25 + $0x68] sm:$0xff] (%p50_p3) }
  0x15   : > { %v166_v8 = vld [vmem:[%s137_s25 + $0x80] sm:$0xff]  ;;  %163 = vst [vmem:[%s134_s26 + $0x30] sm:$0xff] %v162_v6  ;;  %165 = vst [vmem:[%s134_s26 + $0x38] sm:$0xff] %v164_v7  ;;  %v168_v9 = vld [vmem:[%s137_s25 + $0x88] sm:$0xff] }
  0x16   : > { %167 = vst [vmem:[%s134_s26 + $0x40] sm:$0xff] %v166_v8  ;;  %169 = vst [vmem:[%s134_s26 + $0x48] sm:$0xff] %v168_v9 }
  0x17 PF: > { %p382_p5 = scmp.ge.s32.totalorder %s450_s14, 1  ;;  %p174_p6 = scmp.lt.s32.totalorder %s450_s14, 3 }
  0x19   : > { %p175_p7 = pnand %p382_p5, %p174_p6 }
  0x1a   : > { %s181_s27 = sand.u32 (!%p175_p7), 1, %s442_s12   ;;  %v452_v10 = vmov (!%p175_p7), 0.0   ;;  %v453_v11 = vmov (!%p175_p7), 0   ;;  %v222_v12 = vld [vmem:[%s534_s2] sm:$0xff] (!%p175_p7)  ;;  %vm232_vm0 = vcmask (!%p175_p7), 1043456   ;;  %vm228_vm1 = vcmask (!%p175_p7), 293888  }
  0x1b   : > { %178 = sbr.rel (%p175_p7) target bundleno = 262 (0x106), region = 51  ;;  %303 = vmatprep.mubr.f32.mxu0 (!%p175_p7), %v452_v10  ;;  %427 = vset.pattern.permute.xlu0 (!%p175_p7), %v453_v11  ;;  %v211_v27 = vld [vmem:[%s532_s0] sm:$0xff] (!%p175_p7)  ;;  %s383_s7 = sshll.u32 (!%p175_p7), %s376_s15, 1 }
  0x1c   : > { %s400_s28 = smul.u32 (!%p175_p7), 80, %s181_s27  ;;  %225 = vperm.xlu0 (!%p175_p7), %427, %v222_v12   ;;  %p206_p8 = scmp.lt.s32.totalorder (!%p175_p7), %s383_s7, 3 }
  0x1e   : > { %s183_s4 = scalar_lea.vmem (!%p175_p7), [#allocation2], %s400_s28 }
  0x1f   : > { %v213_v13 = vld [vmem:[%s183_s4 + $0x8] sm:$0xff] (!%p175_p7)  ;;  %v215_v14 = vld [vmem:[%s183_s4 + $0x18] sm:$0xff] (!%p175_p7)  ;;  %v212_v15 = vld [vmem:[%s183_s4] sm:$0xff] (!%p175_p7) }
  0x20   : > { %v391_v16 = vpack.c.bf16 (!%p175_p7), %v215_v14, %v213_v13  ;;  %v214_v17 = vld [vmem:[%s183_s4 + $0x10] sm:$0xff] (!%p175_p7)  ;;  %v217_v18 = vld [vmem:[%s183_s4 + $0x28] sm:$0xff] (!%p175_p7)  ;;  %v219_v19 = vld [vmem:[%s183_s4 + $0x38] sm:$0xff] (!%p175_p7) }
  0x21   : > { %v393_v20 = vpack.c.bf16 (!%p175_p7), %v214_v17, %v212_v15  ;;  %v395_v21 = vpack.c.bf16 (!%p175_p7), %v219_v19, %v217_v18  ;;  %v216_v22 = vld [vmem:[%s183_s4 + $0x20] sm:$0xff] (!%p175_p7)  ;;  %v218_v23 = vld [vmem:[%s183_s4 + $0x30] sm:$0xff] (!%p175_p7)  ;;  %v221_v25 = vld [vmem:[%s183_s4 + $0x48] sm:$0xf] (!%p175_p7) }
  0x22   : > { %392 = vmatprep.subr.bf16.mxu0 %v391_v16  ;;  %v397_v24 = vpack.c.bf16 %v218_v23, %v216_v22  ;;  %v220_v26 = vld [vmem:[%s183_s4 + $0x40] sm:$0xf]  ;;  %s540_s7 = smov (!%p206_p8, %s383_s7), 3 }
  0x23   : > { %394 = vmatpush1.bf16.msra.mxu0 %v393_v20  ;;  %s384_s8 = sshll.u32 %s540_s7, 3 }
  0x24   : > { %396 = vmatprep.subr.bf16.mxu0 %v395_v21  ;;  %s209_s11 = scalar_lea.vmem %s535_s3, %s384_s8 }
  0x27   : > { %398 = vmatpush1.bf16.msra.mxu0 %v397_v24 }
  0x28   : > { %385 = vmatprep.subr.msk.mxu0 %vm232_vm0, %v221_v25 }
  0x2b   : > { %386 = vmatpush1.msk.msra.mxu0 %vm232_vm0, %v220_v26 }
  0x2c   : > { %387 = vmatmul.mubr.msk.f32.vlgmr.msra.gmra.mrb[0].mxu0 %vm228_vm1, %v211_v27 }
  0x9b   : > { %v226_v28 = vpop.permute.xlu0 %225 }
  0xff   : > { %v305_v29 = vpop.f32.mrb[0].mxu0 }
 0x100   : > { %v306_v30 = vadd.f32 %v305_v29, %v226_v28  ;;  %v307_v31 = vpop.f32.mrb[1].mxu0 }
 0x101   : > { %v308_v32 = vadd.f32 %v307_v31, %v226_v28 }
 0x102   : > { %v310_v33 = vmax.f32 %v306_v30, 0.0 }
 0x103   : > { %v311_v34 = vmax.f32 %v308_v32, 0.0 }
 0x104   : > { %312 = vst [vmem:[%s209_s11] sm:$0xff] %v310_v33 }
 0x105   : > { %313 = vst [vmem:[%s209_s11 + $0x8] sm:$0xff] %v311_v34 }
 0x106 PF: > { %p10_p9 = scmp.ge.s32.totalorder %s491_s16, 4   ;;  %s536_s12 = smov %s446_s13 }
 0x107   : > { %s537_s13 = smov %s500_s19  ;;  %s538_s14 = smov %s491_s16 }
 0x108   :  { %12 = sbr.rel (!%p10_p9) target bundleno = 2 (0x2), region = 90 }

</bundles_post_ra>
